<compile_context>
chip_gen: v7x
topology: tpu7x:2x2x1
jax: 0.10.0
libtpu: 0.0.40
codegen_flags: <defaults>
</compile_context>

<pallas_src>
import math
import functools

import jax
import jax.numpy as jnp
from jax.experimental import pallas as pl
from jax.experimental.pallas import tpu as pltpu

HIDDEN = 32


def _round_up(x, m):
    return ((x + m - 1) // m) * m


def _vmem_budgets():
    """(tile_budget_bytes, vmem_limit_bytes), generation-aware."""
    try:
        cap = int(pltpu.get_tpu_info().vmem_capacity_bytes)
    except Exception:  # interpret mode / older jax: assume the small (v7x) case
        cap = 64 << 20
    if cap >= (100 << 20):        # v5e / v6e: 128 MiB VMEM
        return 88 << 20, 100 << 20
    else:                         # v7x: 64 MiB per TensorCore
        return 28 << 20, 48 << 20


def _mlp_kernel(x_ref, w1_ref, b1_ref, w2_ref, b2_ref, w3_ref, b3_ref,
                wo_t_ref, bo_t_ref, o_ref, *, to_binary):
    # x arrives as f32 straight from HBM; cast to bf16 here (VPU, hidden under
    # the DMA/HBM bottleneck) so layer 1 runs as a bf16 MXU matmul with f32
    # accumulation.  w1 is already bf16.
    xb = x_ref[...].astype(jnp.bfloat16)
    h = jnp.dot(xb, w1_ref[...], preferred_element_type=jnp.float32)
    h = jnp.maximum(h + b1_ref[...], 0.0)

    h = jnp.dot(h, w2_ref[...], preferred_element_type=jnp.float32)
    h = jnp.maximum(h + b2_ref[...], 0.0)

    h = jnp.dot(h, w3_ref[...], preferred_element_type=jnp.float32)
    h = jnp.maximum(h + b3_ref[...], 0.0)

    # Final layer computed transposed: (out_dim, tb) so the (large) batch dim
    # sits on the lane axis -> lane-dense, unmasked output stores.
    # wo_t_ref: (out_dim, HIDDEN); contract its axis 1 with h's axis 1.
    # TODO(synk): confirm via pl.lower_as_mlir that this lowers to a single
    # XLU transpose of the tiny wo_t + one MXU matmul (no VMEM relayout of h).
    y = jax.lax.dot_general(
        wo_t_ref[...], h,
        dimension_numbers=(((1,), (1,)), ((), ())),
        preferred_element_type=jnp.float32)
    y = y + bo_t_ref[...]                      # (out_dim, 1) broadcasts on lanes
    if to_binary == 1:
        y = jax.nn.sigmoid(y)
    o_ref[...] = y.astype(o_ref.dtype)


def _pick_batch_tile(B, F_in, out_dim, vmem_budget):
    """Largest legal batch tile whose VMEM footprint fits the budget.

    Models lane padding ((sub,lane) tiles: 32->128 lanes, F_in->ceil/128),
    bf16 sublane packing for w1, the in-kernel bf16 copy of the x tile, and
    double-buffering of every BlockSpec (including constant-index weights).
    Result is either == B (full-dim block, always legal) or a multiple of 128.
    """
    F_pad = _round_up(F_in, 128)          # lane-padded x feature dim
    H_pad = 128                            # 32 -> 128 lane pad
    out_sub = _round_up(out_dim, 8)

    weight_bytes = 2 * (                   # x2: Pallas double-buffers these too
        _round_up(F_in, 16) * H_pad * 2    # w1 bf16 (sublane-packed, lane-padded)
        + 2 * 32 * H_pad * 4               # w2, w3 f32
        + out_sub * H_pad * 4              # wo_t f32
        + 3 * 8 * H_pad * 4                # b1, b2, b3 (1,32) -> (8,128)
        + out_sub * 128 * 4)               # bo_t (out_dim,1) -> (out_sub,128)

    per_row = (2 * F_pad * 4               # double-buffered f32 x tile
               + F_pad * 2                 # in-kernel bf16 copy of the x tile
               + 4 * H_pad * 4             # f32 hidden intermediates (lane-padded)
               + 3 * out_sub * 4)          # double-buffered + temp transposed output

    avail = vmem_budget - weight_bytes
    # TODO(synk): if avail < 128*per_row (huge F_in, e.g. flattened images
    # >~16K features), add a K-tiling grid axis over F_in for layer 1 with a
    # pl.when-managed accumulator instead of overshooting the budget here.
    tb_max = max(avail // per_row, 128)
    tb_max = (tb_max // 128) * 128

    if B <= tb_max:
        tb = B                              # whole batch in one block
    else:
        tb = tb_max                         # multiple of 128

    # Ensure >= 2 grid steps when the batch is large enough: lets
    # dimension_semantics=("parallel",) shard across v7x's two TensorCores and
    # gives the pipeline a next tile to prefetch on every generation.
    if B >= 256:
        half = _round_up(pl.cdiv(B, 2), 128)
        tb = min(tb, half)

    return max(tb, 1)


def pt_mdl_dnn_forward(x, params, *, to_binary=0):
    """x: any shape (B, ...); flattened to (B, F) like nn.Flatten."""
    B = x.shape[0]
    xf = jnp.reshape(x, (B, -1))            # stays f32; bf16 cast is in-kernel
    if xf.dtype != jnp.float32:
        xf = xf.astype(jnp.float32)
    F_in = xf.shape[1]

    w1, b1, w2, b2, w3, b3, wo, bo = params
    out_dim = wo.shape[1]

    w1b = w1.astype(jnp.bfloat16)           # tiny one-off convert
    wo_t = wo.T                             # (out_dim, HIDDEN)
    bo_t = bo.T                             # (out_dim, 1)

    tile_budget, vmem_limit = _vmem_budgets()
    tb = _pick_batch_tile(B, F_in, out_dim, tile_budget)
    grid = (pl.cdiv(B, tb),)

    def full(shape):
        # Small weight/bias blocks: fully VMEM-resident every grid step.
        return pl.BlockSpec(shape, lambda i: (0, 0))

    kernel = functools.partial(_mlp_kernel, to_binary=to_binary)

    flops = 2 * B * (F_in * HIDDEN + 2 * HIDDEN * HIDDEN + HIDDEN * out_dim)
    bytes_accessed = (B * F_in * 4 + B * out_dim * 4
                      + F_in * HIDDEN * 2 + 2 * HIDDEN * HIDDEN * 4
                      + HIDDEN * out_dim * 4 + (3 * HIDDEN + out_dim) * 4)
    transcendentals = B * out_dim if to_binary == 1 else 0

    y_t = pl.pallas_call(
        kernel,
        out_shape=jax.ShapeDtypeStruct((out_dim, B), jnp.float32),
        grid=grid,
        in_specs=[
            pl.BlockSpec((tb, F_in), lambda i: (i, 0)),        # x batch tile (f32)
            full((F_in, HIDDEN)), full((1, HIDDEN)),            # dnn1 (bf16 w)
            full((HIDDEN, HIDDEN)), full((1, HIDDEN)),           # dnn2
            full((HIDDEN, HIDDEN)), full((1, HIDDEN)),           # dnn3
            full((out_dim, HIDDEN)), full((out_dim, 1)),         # out (transposed)
        ],
        out_specs=pl.BlockSpec((out_dim, tb), lambda i: (0, i)),
        compiler_params=pltpu.CompilerParams(
            dimension_semantics=("parallel",),
            vmem_limit_bytes=vmem_limit),
        cost_estimate=pl.CostEstimate(
            flops=flops,
            transcendentals=transcendentals,
            bytes_accessed=bytes_accessed),
    )(xf, w1b, b1, w2, b2, w3, b3, wo_t, bo_t)

    # Keep the module's (B, out_dim) contract.  If the consumer can take
    # (out_dim, B) directly, return y_t to save this tail transpose pass.
    return y_t.T


def init_params(key, inp, out):
    """Deterministic init mirroring the PyTorch module.

    dnn1/2/3: init_layer -> weight ~ U(-scale, scale) with
              scale = sqrt(2/fan_in)*sqrt(3), bias = 0.
    out:      PyTorch nn.Linear default -> U(-1/sqrt(fan_in), 1/sqrt(fan_in))
              for both weight and bias.
    Weights stored as (in, out) = transpose of PyTorch's (out, in).
    """
    keys = jax.random.split(key, 6)

    def he_uniform(k, fan_in, fan_out):
        scale = math.sqrt(2.0 / fan_in) * math.sqrt(3.0)
        return jax.random.uniform(k, (fan_in, fan_out), jnp.float32,
                                  minval=-scale, maxval=scale)

    w1 = he_uniform(keys[0], inp, HIDDEN)
    b1 = jnp.zeros((1, HIDDEN), jnp.float32)
    w2 = he_uniform(keys[1], HIDDEN, HIDDEN)
    b2 = jnp.zeros((1, HIDDEN), jnp.float32)
    w3 = he_uniform(keys[2], HIDDEN, HIDDEN)
    b3 = jnp.zeros((1, HIDDEN), jnp.float32)

    bound = 1.0 / math.sqrt(HIDDEN)
    wo = jax.random.uniform(keys[3], (HIDDEN, out), jnp.float32,
                            minval=-bound, maxval=bound)
    bo = jax.random.uniform(keys[4], (1, out), jnp.float32,
                            minval=-bound, maxval=bound)
    return (w1, b1, w2, b2, w3, b3, wo, bo)


def _reference(xf, params, to_binary):
    # Mirrors the kernel's dtype policy: bf16 x/w1 inputs, f32 accumulation,
    # f32 everywhere else.  (bf16 layer-1 is a deliberate deviation from the
    # fp32 PyTorch model; f32 accumulation keeps the error ~1e-3 relative.)
    w1, b1, w2, b2, w3, b3, wo, bo = params
    xb = xf.astype(jnp.bfloat16)
    w1b = w1.astype(jnp.bfloat16)
    h = jnp.maximum(jnp.dot(xb, w1b, preferred_element_type=jnp.float32) + b1, 0.0)
    h = jnp.maximum(jnp.dot(h, w2, preferred_element_type=jnp.float32) + b2, 0.0)
    h = jnp.maximum(jnp.dot(h, w3, preferred_element_type=jnp.float32) + b3, 0.0)
    y = jnp.dot(h, wo, preferred_element_type=jnp.float32) + bo
    return jax.nn.sigmoid(y) if to_binary == 1 else y


if __name__ == "__main__":
    key = jax.random.PRNGKey(0)
    k_x, k_p = jax.random.split(key)

    # Small example consistent with the module: x (8, 4, 16) -> Flatten ->
    # (8, 64); inp = 64, out = 4.
    batch, C, W, out_dim = 8, 4, 16, 4
    inp = C * W
    x = jax.random.normal(k_x, (batch, C, W), jnp.float32)
    params = init_params(k_p, inp, out_dim)

    ok = True
    for to_binary in (0, 1):
        y = pt_mdl_dnn_forward(x, params, to_binary=to_binary)
        y = jax.block_until_ready(y)
        y_ref = _reference(jnp.reshape(x, (batch, -1)), params, to_binary)
        ok &= (y.shape == (batch, out_dim))
        ok &= bool(jnp.allclose(y, y_ref, atol=2e-3, rtol=2e-3))

    assert ok, "mismatch vs reference"
    print("KERNEL_OK")
</pallas_src>

<mosaic_0001>
module attributes {stable_mosaic.version = 11 : i64} {
  func.func @_mlp_kernel(%arg0: i32, %arg1: memref<8x64xf32, #tpu.memory_space<vmem>>, %arg2: memref<64x32xbf16, #tpu.memory_space<vmem>>, %arg3: memref<1x32xf32, #tpu.memory_space<vmem>>, %arg4: memref<32x32xf32, #tpu.memory_space<vmem>>, %arg5: memref<1x32xf32, #tpu.memory_space<vmem>>, %arg6: memref<32x32xf32, #tpu.memory_space<vmem>>, %arg7: memref<1x32xf32, #tpu.memory_space<vmem>>, %arg8: memref<4x32xf32, #tpu.memory_space<vmem>>, %arg9: memref<4x1xf32, #tpu.memory_space<vmem>>, %arg10: memref<4x8xf32, #tpu.memory_space<vmem>>) attributes {dimension_semantics = [#tpu.dimension_semantics<parallel>], iteration_bounds = array<i64: 1>, scalar_prefetch = 0 : i64, scratch_operands = 0 : i64, tpu.core_type = #tpu.core_type<tc>, window_params = [{transform_indices = @transform_0, window_bounds = array<i64: 8, 64>}, {pipeline_mode = #tpu.pipeline_mode<synchronous>, transform_indices = @transform_1, window_bounds = array<i64: 64, 32>}, {pipeline_mode = #tpu.pipeline_mode<synchronous>, transform_indices = @transform_2, window_bounds = array<i64: 1, 32>}, {pipeline_mode = #tpu.pipeline_mode<synchronous>, transform_indices = @transform_3, window_bounds = array<i64: 32, 32>}, {pipeline_mode = #tpu.pipeline_mode<synchronous>, transform_indices = @transform_4, window_bounds = array<i64: 1, 32>}, {pipeline_mode = #tpu.pipeline_mode<synchronous>, transform_indices = @transform_5, window_bounds = array<i64: 32, 32>}, {pipeline_mode = #tpu.pipeline_mode<synchronous>, transform_indices = @transform_6, window_bounds = array<i64: 1, 32>}, {pipeline_mode = #tpu.pipeline_mode<synchronous>, transform_indices = @transform_7, window_bounds = array<i64: 4, 32>}, {pipeline_mode = #tpu.pipeline_mode<synchronous>, transform_indices = @transform_8, window_bounds = array<i64: 4, 1>}, {transform_indices = @transform_9, window_bounds = array<i64: 4, 8>}]} {
    %c0 = arith.constant 0 : index
    %c0_0 = arith.constant 0 : index
    %0 = vector.load %arg1[%c0, %c0_0] : memref<8x64xf32, #tpu.memory_space<vmem>>, vector<8x64xf32>
    %1 = arith.truncf %0 : vector<8x64xf32> to vector<8x64xbf16>
    %c0_1 = arith.constant 0 : index
    %c0_2 = arith.constant 0 : index
    %2 = vector.load %arg2[%c0_1, %c0_2] : memref<64x32xbf16, #tpu.memory_space<vmem>>, vector<64x32xbf16>
    %cst = arith.constant dense<0.000000e+00> : vector<8x32xf32>
    %3 = tpu.matmul %1, %2, %cst {dimension_numbers = #tpu.dot_dimension_numbers<[1], [0], [0], [1], [0, 0, 1, 1], [], []>} : vector<8x64xbf16>, vector<64x32xbf16>, vector<8x32xf32> -> vector<8x32xf32>
    %c0_3 = arith.constant 0 : index
    %c0_4 = arith.constant 0 : index
    %4 = vector.load %arg3[%c0_3, %c0_4] : memref<1x32xf32, #tpu.memory_space<vmem>>, vector<1x32xf32>
    %5 = vector.broadcast %4 : vector<1x32xf32> to vector<8x32xf32>
    %6 = arith.addf %3, %5 : vector<8x32xf32>
    %cst_5 = arith.constant 0.000000e+00 : f32
    %7 = vector.broadcast %cst_5 : f32 to vector<8x32xf32>
    %8 = arith.maximumf %6, %7 : vector<8x32xf32>
    %c0_6 = arith.constant 0 : index
    %c0_7 = arith.constant 0 : index
    %9 = vector.load %arg4[%c0_6, %c0_7] : memref<32x32xf32, #tpu.memory_space<vmem>>, vector<32x32xf32>
    %cst_8 = arith.constant dense<0.000000e+00> : vector<8x32xf32>
    %10 = tpu.matmul %8, %9, %cst_8 {dimension_numbers = #tpu.dot_dimension_numbers<[1], [0], [0], [1], [0, 0, 1, 1], [], []>} : vector<8x32xf32>, vector<32x32xf32>, vector<8x32xf32> -> vector<8x32xf32>
    %c0_9 = arith.constant 0 : index
    %c0_10 = arith.constant 0 : index
    %11 = vector.load %arg5[%c0_9, %c0_10] : memref<1x32xf32, #tpu.memory_space<vmem>>, vector<1x32xf32>
    %12 = vector.broadcast %11 : vector<1x32xf32> to vector<8x32xf32>
    %13 = arith.addf %10, %12 : vector<8x32xf32>
    %cst_11 = arith.constant 0.000000e+00 : f32
    %14 = vector.broadcast %cst_11 : f32 to vector<8x32xf32>
    %15 = arith.maximumf %13, %14 : vector<8x32xf32>
    %c0_12 = arith.constant 0 : index
    %c0_13 = arith.constant 0 : index
    %16 = vector.load %arg6[%c0_12, %c0_13] : memref<32x32xf32, #tpu.memory_space<vmem>>, vector<32x32xf32>
    %cst_14 = arith.constant dense<0.000000e+00> : vector<8x32xf32>
    %17 = tpu.matmul %15, %16, %cst_14 {dimension_numbers = #tpu.dot_dimension_numbers<[1], [0], [0], [1], [0, 0, 1, 1], [], []>} : vector<8x32xf32>, vector<32x32xf32>, vector<8x32xf32> -> vector<8x32xf32>
    %c0_15 = arith.constant 0 : index
    %c0_16 = arith.constant 0 : index
    %18 = vector.load %arg7[%c0_15, %c0_16] : memref<1x32xf32, #tpu.memory_space<vmem>>, vector<1x32xf32>
    %19 = vector.broadcast %18 : vector<1x32xf32> to vector<8x32xf32>
    %20 = arith.addf %17, %19 : vector<8x32xf32>
    %cst_17 = arith.constant 0.000000e+00 : f32
    %21 = vector.broadcast %cst_17 : f32 to vector<8x32xf32>
    %22 = arith.maximumf %20, %21 : vector<8x32xf32>
    %c0_18 = arith.constant 0 : index
    %c0_19 = arith.constant 0 : index
    %23 = vector.load %arg8[%c0_18, %c0_19] : memref<4x32xf32, #tpu.memory_space<vmem>>, vector<4x32xf32>
    %cst_20 = arith.constant dense<0.000000e+00> : vector<4x8xf32>
    %24 = tpu.matmul %23, %22, %cst_20 {dimension_numbers = #tpu.dot_dimension_numbers<[1], [1], [0], [0], [0, 0, 1, 0], [], []>} : vector<4x32xf32>, vector<8x32xf32>, vector<4x8xf32> -> vector<4x8xf32>
    %c0_21 = arith.constant 0 : index
    %c0_22 = arith.constant 0 : index
    %25 = vector.load %arg9[%c0_21, %c0_22] : memref<4x1xf32, #tpu.memory_space<vmem>>, vector<4x1xf32>
    %26 = vector.broadcast %25 : vector<4x1xf32> to vector<4x8xf32>
    %27 = arith.addf %24, %26 : vector<4x8xf32>
    %c0_23 = arith.constant 0 : index
    %c0_24 = arith.constant 0 : index
    %28 = vector.load %arg10[%c0_23, %c0_24] : memref<4x8xf32, #tpu.memory_space<vmem>>, vector<4x8xf32>
    tpu.vector_store %arg10[%c0_23, %c0_24], %27 {strides = array<i32>} : memref<4x8xf32, #tpu.memory_space<vmem>>, vector<4x8xf32>,
    return
  }
  func.func @transform_0(%arg0: i32) -> (i32, i32) {
    %c0_i32 = arith.constant 0 : i32
    %c0_i32_0 = arith.constant 0 : i32
    return %arg0, %c0_i32 : i32, i32
  }
  func.func @transform_1(%arg0: i32) -> (i32, i32) {
    %c0_i32 = arith.constant 0 : i32
    %c0_i32_0 = arith.constant 0 : i32
    %c0_i32_1 = arith.constant 0 : i32
    return %c0_i32, %c0_i32_0 : i32, i32
  }
  func.func @transform_2(%arg0: i32) -> (i32, i32) {
    %c0_i32 = arith.constant 0 : i32
    %c0_i32_0 = arith.constant 0 : i32
    %c0_i32_1 = arith.constant 0 : i32
    return %c0_i32, %c0_i32_0 : i32, i32
  }
  func.func @transform_3(%arg0: i32) -> (i32, i32) {
    %c0_i32 = arith.constant 0 : i32
    %c0_i32_0 = arith.constant 0 : i32
    %c0_i32_1 = arith.constant 0 : i32
    return %c0_i32, %c0_i32_0 : i32, i32
  }
  func.func @transform_4(%arg0: i32) -> (i32, i32) {
    %c0_i32 = arith.constant 0 : i32
    %c0_i32_0 = arith.constant 0 : i32
    %c0_i32_1 = arith.constant 0 : i32
    return %c0_i32, %c0_i32_0 : i32, i32
  }
  func.func @transform_5(%arg0: i32) -> (i32, i32) {
    %c0_i32 = arith.constant 0 : i32
    %c0_i32_0 = arith.constant 0 : i32
    %c0_i32_1 = arith.constant 0 : i32
    return %c0_i32, %c0_i32_0 : i32, i32
  }
  func.func @transform_6(%arg0: i32) -> (i32, i32) {
    %c0_i32 = arith.constant 0 : i32
    %c0_i32_0 = arith.constant 0 : i32
    %c0_i32_1 = arith.constant 0 : i32
    return %c0_i32, %c0_i32_0 : i32, i32
  }
  func.func @transform_7(%arg0: i32) -> (i32, i32) {
    %c0_i32 = arith.constant 0 : i32
    %c0_i32_0 = arith.constant 0 : i32
    %c0_i32_1 = arith.constant 0 : i32
    return %c0_i32, %c0_i32_0 : i32, i32
  }
  func.func @transform_8(%arg0: i32) -> (i32, i32) {
    %c0_i32 = arith.constant 0 : i32
    %c0_i32_0 = arith.constant 0 : i32
    %c0_i32_1 = arith.constant 0 : i32
    return %c0_i32, %c0_i32_0 : i32, i32
  }
  func.func @transform_9(%arg0: i32) -> (i32, i32) {
    %c0_i32 = arith.constant 0 : i32
    %c0_i32_0 = arith.constant 0 : i32
    return %c0_i32, %arg0 : i32, i32
  }
}

</mosaic_0001>

<bundles_post_ra>
// kernel: tpu_custom_call.1
= control target key start
LH: loop header
LB: loop body
LE: loop exit
PB: predicated region body
PF: predicated region fallthrough
CT: control target
= control target key end

     0   :  { %14 = vsyncpa [#allocation3], 0  ;;  %s773_s0 = inlined_call_operand.hbm [shape: f32[8,64], index: 0, kind: input, shape index: {}]   ;;  %s774_s1 = inlined_call_operand.vmem [shape: bf16[64,32], index: 1, kind: input, shape index: {}]   ;;  %s775_s2 = inlined_call_operand.hbm [shape: f32[1,32], index: 2, kind: input, shape index: {}]   ;;  %s776_s3 = inlined_call_operand.vmem [shape: f32[32,32], index: 3, kind: input, shape index: {}]   ;;  %s777_s4 = inlined_call_operand.hbm [shape: f32[1,32], index: 4, kind: input, shape index: {}]   ;;  %s778_s5 = inlined_call_operand.vmem [shape: f32[32,32], index: 5, kind: input, shape index: {}]   ;;  %s779_s6 = inlined_call_operand.vmem [shape: f32[1,32], index: 6, kind: input, shape index: {}]   ;;  %s780_s7 = inlined_call_operand.vmem [shape: f32[4,32], index: 7, kind: input, shape index: {}]   ;;  %s781_s8 = inlined_call_operand.vmem [shape: f32[4,1], index: 8, kind: input, shape index: {}]   ;;  %s782_s9 = inlined_call_operand.hbm [shape: f32[4,8], index: 9, kind: output, shape index: {}]  }
   0x1   :  { %15 = vsyncpa [#allocation6], 0 }
   0x2   :  { %16 = vsyncpa [#allocation4], 0  ;;  %s614_s30 = smov [#allocation5]   ;;  %s615_s11 = smov [#allocation2]  }
   0x3   :  { %s35_s10 = sshll.u32 %s614_s30, 4  ;;  %s23_s12 = sshll.u32 %s615_s11, 4  ;;  %s36_s10 = int_to_ptr.vmem [resolvable:$true] %s35_s10  ;;  %s24_s12 = int_to_ptr.vmem [resolvable:$true] %s23_s12 }
   0x4   :  { %s520_s15 = scalar_lea.hbm %s775_s2, 16 }
   0x5   :  { %p521_p0 = scmp.ne.s32.totalorder %s775_s2, %s520_s15  ;;  %p524_p1 = scmp.lt.u32.totalorder %s520_s15, %s775_s2 }
   0x7   :  { %p526_p2 = pnand %p524_p1, %p521_p0 }
   0x9   :  { %529 = shalt.err (!%p526_p2)
}
   0xa   :  { %s530_s20 = scalar_lea.vmem %s36_s10, 16  ;;  %s534_s21 = scalar_lea.vmem %s36_s10, 32 }
   0xb   :  { %p531_p3 = scmp.ne.s32.totalorder %s36_s10, %s530_s20  ;;  %p535_p4 = scmp.lt.s32.totalorder %s36_s10, %s36_s10 }
   0xc   :  { %p536_p5 = scmp.lt.s32.totalorder %s534_s21, %s530_s20 }
   0xe   :  { %p537_p6 = por %p536_p5, %p535_p4 }
  0x10   :  { %p538_p7 = pnand %p537_p6, %p531_p3 }
  0x12   :  { %541 = shalt.err (!%p538_p7)
}
  0x13   :  { %38 = dma.hbm_to_vmem [thread:$0]  %s775_s2, 16, %s36_s10, [#allocation6]  }
  0x14   :  { %s542_s26 = scalar_lea.hbm %s773_s0, 128 }
  0x15   :  { %p543_p8 = scmp.ne.s32.totalorder %s773_s0, %s542_s26  ;;  %p546_p9 = scmp.lt.u32.totalorder %s542_s26, %s773_s0 }
  0x17   :  { %p548_p10 = pnand %p546_p9, %p543_p8 }
  0x19   :  { %551 = shalt.err (!%p548_p10)
}
  0x1a   :  { %s552_s11 = scalar_lea.vmem %s24_s12, 128  ;;  %p557_p12 = scmp.lt.s32.totalorder %s24_s12, %s24_s12 }
  0x1b   :  { %p553_p11 = scmp.ne.s32.totalorder %s24_s12, %s552_s11  ;;  %p558_p13 = scmp.lt.s32.totalorder %s552_s11, %s552_s11 }
  0x1d   :  { %p559_p0 = por %p558_p13, %p557_p12 }
  0x1f   :  { %p560_p1 = pnand %p559_p0, %p553_p11 }
  0x21   :  { %563 = shalt.err (!%p560_p1)
}
  0x22   :  { %26 = dma.hbm_to_vmem [thread:$0]  %s773_s0, 128, %s24_s12, [#allocation3]  }
  0x23   :  { %s616_s13 = smov [#allocation7]   ;;  %s564_s17 = scalar_lea.hbm %s777_s4, 16 }
  0x24   :  { %s47_s14 = sshll.u32 %s616_s13, 4  ;;  %p565_p2 = scmp.ne.s32.totalorder %s777_s4, %s564_s17  ;;  %s48_s14 = int_to_ptr.vmem [resolvable:$true] %s47_s14 }
  0x25   :  { %p568_p3 = scmp.lt.u32.totalorder %s564_s17, %s777_s4 }
  0x27   :  { %p570_p4 = pnand %p568_p3, %p565_p2 }
  0x29   :  { %573 = shalt.err (!%p570_p4)
}
  0x2a   :  { %s574_s22 = scalar_lea.vmem %s48_s14, 16  ;;  %s578_s0 = scalar_lea.vmem %s48_s14, 32 }
  0x2b   :  { %p575_p5 = scmp.ne.s32.totalorder %s48_s14, %s574_s22  ;;  %p579_p6 = scmp.lt.s32.totalorder %s48_s14, %s48_s14 }
  0x2c   :  { %p580_p7 = scmp.lt.s32.totalorder %s578_s0, %s574_s22 }
  0x2e   :  { %p581_p8 = por %p580_p7, %p579_p6 }
  0x30   :  { %p582_p9 = pnand %p581_p8, %p575_p5 }
  0x32   :  { %585 = shalt.err (!%p582_p9)
}
  0x33   :  { %50 = dma.hbm_to_vmem [thread:$0]  %s777_s4, 16, %s48_s14, [#allocation6]  }
  0x34   :  { %608 = dma.done.wait [#allocation3], 128  }
  0x35   :  { %609 = vsyncadd [#allocation3], 4294967168 }
  0x36   :  { %610 = dma.done.wait [#allocation6], 32  }
  0x37   :  { %611 = vsyncadd [#allocation6], 4294967264  ;;  %v617_v0 = vmov 0.0   ;;  %vm618_vm0 = vmmov 0   ;;  %v619_v1 = vmov 0.0|0.0   ;;  %v516_v2 = vld [vmem:[%s774_s1] sm:$0xff]  }
  0x38   :  { %456 = vmatprep.subr.bf16.mxu0 %v617_v0  ;;  %464 = vmatprep.mubr.msk.bf16.mxu0 %vm618_vm0, %v617_v0  ;;  %v517_v3 = vld [vmem:[%s774_s1 + $0x8] sm:$0xff]   ;;  %v155_v4 = vld [vmem:[%s776_s3] sm:$0xff]  ;;  %v518_v7 = vld [vmem:[%s774_s1 + $0x10] sm:$0xff]   ;;  %vm110_vm1 = vcmask 523264   ;;  %vm166_vm2 = vcmask 261120   ;;  %v620_v33 = vmov 0  }
  0x39   :  { %495 = vmatprep.subr.bf16.mxu1 %v619_v1  ;;  %476 = vmatprep.mubr.msk.f32.mxu1 %vm618_vm0, %v617_v0  ;;  %v156_v5 = vld [vmem:[%s776_s3 + $0x8] sm:$0xff]  ;;  %v519_v8 = vld [vmem:[%s774_s1 + $0x18] sm:$0xff]   ;;  %v69_v9 = vld [vmem:[#allocation2] sm:$0xff]  ;;  %vm409_vm3 = vcmask 60416  }
  0x3a   :  { %457 = vmatpush3.bf16.msra.mxu0 %v516_v2  ;;  %v496_v6 = vpack.c.bf16 %v156_v5, %v155_v4  ;;  %v70_v10 = vpack.c.bf16 %v69_v9, %v69_v9  ;;  %v157_v11 = vld [vmem:[%s776_s3 + $0x10] sm:$0xff]  ;;  %v158_v12 = vld [vmem:[%s776_s3 + $0x18] sm:$0xff]  ;;  %v427_v14 = vld [vmem:[#allocation5] ss:$0 sm:$0xff]  ;;  %515 = vset.pattern.permute.xlu0 %v620_v33 }
  0x3b   :  { %458 = vmatprep.subr.bf16.mxu0 %v617_v0  ;;  %v499_v13 = vpack.c.bf16 %v158_v12, %v157_v11  ;;  %v241_v15 = vld [vmem:[%s778_s5] sm:$0xff]  ;;  %v242_v16 = vld [vmem:[%s778_s5 + $0x8] sm:$0xff]  ;;  %v243_v24 = vld [vmem:[%s778_s5 + $0x10] sm:$0xff] }
  0x3c   :  { %497 = vmatpush3.bf16.msra.mxu1 %v496_v6  ;;  %v502_v21 = vpack.c.bf16 %v242_v16, %v241_v15  ;;  %v244_v25 = vld [vmem:[%s778_s5 + $0x18] sm:$0xff]  ;;  %v433_v27 = vld [vmem:[#allocation7] ss:$0 sm:$0xff]  ;;  %v327_v32 = vld [vmem:[%s781_s8] sm:$0xf]  ;;  %s621_s8 = smov [#allocation8]  }
  0x3d   :  { %498 = vmatprep.subr.bf16.mxu1 %v619_v1  ;;  %v505_v26 = vpack.c.bf16 %v244_v25, %v243_v24  ;;  %330 = vperm.xlu0 %515, %v327_v32   ;;  %v435_v34 = vld [vmem:[%s779_s6] ss:$0 sm:$0xff]  ;;  %s417_s4 = sshll.u32 %s621_s8, 4  ;;  %s418_s4 = int_to_ptr.vmem [resolvable:$true] %s417_s4 }
  0x3e   :  { %459 = vmatpush3.bf16.msra.mxu0 %v517_v3  ;;  %v326_v39 = vld [vmem:[%s780_s7] sm:$0xf]  ;;  %s586_s6 = scalar_lea.vmem %s418_s4, 64  ;;  %p591_p11 = scmp.lt.s32.totalorder %s418_s4, %s418_s4 }
  0x3f   :  { %460 = vmatprep.subr.bf16.mxu0 %v617_v0  ;;  %p587_p10 = scmp.ne.s32.totalorder %s418_s4, %s586_s6  ;;  %p592_p12 = scmp.lt.s32.totalorder %s586_s6, %s586_s6 }
  0x40   :  { %500 = vmatpush3.bf16.msra.mxu1 %v499_v13 }
  0x41   :  { %501 = vmatprep.subr.bf16.mxu1 %v619_v1  ;;  %p593_p13 = por %p592_p12, %p591_p11 }
  0x42   :  { %461 = vmatpush3.bf16.msra.mxu0 %v518_v7 }
  0x43   :  { %462 = vmatprep.subr.bf16.mxu0 %v617_v0  ;;  %p594_p0 = pnand %p593_p13, %p587_p10 }
  0x46   :  { %463 = vmatpush3.bf16.msra.mxu0 %v519_v8 }
  0x49   :  { %465 = vmatmul.mubr.msk.bf16.vlgmr.msra.gmra.mrb[0].mxu0 %vm110_vm1, %v70_v10 }
  0xbc   :  { %v331_v40 = vpop.permute.xlu0 %330 }
 0x11c   :  { %v148_v17 = vpop.f32.mrb[0].mxu0 }
 0x11d   :  { %v149_v18 = vadd.f32 %v427_v14, %v148_v17  ;;  %v466_v19 = vpop.f32.mrb[1].mxu0 }
 0x11e   :  { %v151_v20 = vpop.f32.mrb[2].mxu0 }
 0x11f   :  { %v154_v22 = vmax.f32 %v149_v18, 0.0  ;;  %v467_v23 = vpop.f32.mrb[3].mxu0 }
 0x121   :  { %477 = vmatmul.mubr.msk.f32.vlgmr.msra.gmra.mrb[0].mxu1 %vm166_vm2, %v154_v22 }
 0x122   :  { %503 = vmatpush3.bf16.msra.mxu1 %v502_v21  ;;  %487 = vmatprep.mubr.msk.f32.mxu1 %vm618_vm0, %v617_v0 }
 0x123   :  { %504 = vmatprep.subr.bf16.mxu1 %v619_v1 }
 0x126   :  { %506 = vmatpush3.bf16.msra.mxu1 %v505_v26 }
 0x127   :  { %490 = vmatprep.subr.mxu1 %v617_v0 }
 0x1f4   :  { %v236_v28 = vpop.f32.mrb[0].mxu1 }
 0x1f5   :  { %v237_v29 = vadd.f32 %v433_v27, %v236_v28  ;;  %v478_v30 = vpop.f32.mrb[1].mxu1 }
 0x1f7   :  { %v240_v31 = vmax.f32 %v237_v29, 0.0 }
 0x1f9   :  { %488 = vmatmul.mubr.msk.f32.vlgmr.msra.gmra.mrb[2].mxu1 %vm166_vm2, %v240_v31 }
 0x1fa   :  { %492 = vmatprep.mubr.msk.f32.mxu1 %vm618_vm0, %v617_v0 }
 0x2cc   :  { %v321_v35 = vpop.f32.mrb[2].mxu1 }
 0x2cd   :  { %v322_v36 = vadd.f32 %v435_v34, %v321_v35  ;;  %v489_v37 = vpop.f32.mrb[3].mxu1 }
 0x2cf   :  { %v325_v38 = vmax.f32 %v322_v36, 0.0 }
 0x2d1   :  { %491 = vmatpush3.xpose.msk.msra.mxu1 %vm166_vm2, %v325_v38 }
 0x2d4   :  { %493 = vmatmul.mubr.msk.f32.vlgmr.msra.gmra.mrb[4].mxu1 %vm166_vm2, %v326_v39 }
 0x3a7   :  { %v405_v41 = vpop.f32.mrb[4].mxu1 }
 0x3a8   :  { %v406_v42 = vadd.f32 %v405_v41, %v331_v40  ;;  %v494_v43 = vpop.f32.mrb[5].mxu1 }
 0x3aa   :  { %410 = vst.msk [vmem:[#allocation8] sm:$0xf] %vm409_vm3, %v406_v42 }
 0x3ab   :  { %597 = shalt.err (!%p594_p0)
}
 0x3ac   :  { %s598_s28 = scalar_lea.hbm %s782_s9, 64 }
 0x3ad   :  { %p599_p1 = scmp.ne.s32.totalorder %s782_s9, %s598_s28  ;;  %p602_p2 = scmp.lt.u32.totalorder %s598_s28, %s782_s9 }
 0x3af   :  { %p604_p3 = pnand %p602_p2, %p599_p1 }
 0x3b1   :  { %607 = shalt.err (!%p604_p3)
}
 0x3b2   :  { %420 = dma.vmem_to_hbm [thread:$0]  %s418_s4, 64, %s782_s9, [#allocation4]  }
 0x3b3   :  { %612 = dma.done.wait [#allocation4], 64  }
 0x3b4   :  { %613 = vsyncadd [#allocation4], 4294967232 }
 0x3b5   :  { %424 = vsyncpa [#allocation3], 1 }
 0x3b6   :  { %425 = vsyncpa [#allocation6], 1 }
 0x3b7   :  { %426 = vsyncpa [#allocation4], 1 }

</bundles_post_ra>
